<compile_context>
chip_gen: v5e
topology: v5e:2x2
jax: 0.10.0
libtpu: 0.0.40
codegen_flags: <defaults>
</compile_context>

<pallas_src>
import functools

import jax
import jax.numpy as jnp
from jax.experimental import pallas as pl
from jax.experimental.pallas import tpu as pltpu


def linnet_kernel(x_ref, enc_ref, w_ref, b_ref, o_ref, *, act_dtype):
    d_in = x_ref.shape[1]
    d_out = o_ref.shape[1]
    n_layers = w_ref.shape[0]
    w_dtype = w_ref.dtype  # bf16 (default) or f32

    # encode(): h = x * scale - offset   (scale/offset precomputed in wrapper;
    # replaces the per-element divide of the original encode()).
    h = x_ref[...] * enc_ref[0:1, :] - enc_ref[1:2, :]          # (tile_b, D_in) f32

    def sigmoid(z):
        # tanh form of sigmoid: the transcendental runs on the EUP slot and the
        # full-precision VPU divide of 1/(1+exp(-z)) disappears.
        z = z.astype(act_dtype)
        return (0.5 * jnp.tanh(0.5 * z) + 0.5)

    # lin1 + sigmoid: only the first d_in rows of the padded (P, P) weight matter.
    z = jnp.dot(h.astype(w_dtype), w_ref[0, :d_in, :],
                preferred_element_type=jnp.float32) + b_ref[0]
    h = sigmoid(z)

    # lin2..lin5 + sigmoid at full padded width P.  Padded weight rows/cols are
    # zero, so the sigmoid(0)=0.5 values living in padded activation lanes
    # contribute nothing downstream (keep the slabs zero-initialized!).
    for l in range(1, n_layers - 1):
        z = jnp.dot(h.astype(w_dtype), w_ref[l],
                    preferred_element_type=jnp.float32) + b_ref[l]
        h = sigmoid(z)

    # lin6: no activation.  Store only the real D_out columns (narrow masked
    # vst, but 16x less HBM writeback than a 128-wide padded f32 row).
    z = jnp.dot(h.astype(w_dtype), w_ref[n_layers - 1],
                preferred_element_type=jnp.float32) + b_ref[n_layers - 1]
    o_ref[...] = z[:, :d_out].astype(o_ref.dtype)


def _pick_batch_tiling(B, *, max_tile_b=4096, split_threshold=128):
    """Choose (tile_b, padded_B).

    B < split_threshold: one grid step (per-step pipeline overhead dominates at
    this model size).  Otherwise: >=2 steps so the 'parallel' batch axis can be
    sharded across cores, tiles capped at max_tile_b and rounded to a multiple
    of 8 sublanes.
    """
    if B < split_threshold:
        return B, B
    tile_b = min(max_tile_b, ((pl.cdiv(B, 2) + 7) // 8) * 8)
    padded_B = pl.cdiv(B, tile_b) * tile_b
    return tile_b, padded_B


def pack_linnet_params(params, xmin, xmax, *, mxu_dtype=jnp.bfloat16):
    """Pack weights/biases into two contiguous zero-padded slabs + encode consts.

    Done ONCE per parameter set (not per forward call).
    params: list of 6 (W, b) with W already shaped (in, out).
    """
    D_in = params[0][0].shape[0]
    n_layers = len(params)

    # Lane-dense pad width for every hidden dim.
    max_dim = max(max(w.shape) for w, _ in params)
    P = ((max(max_dim, 128) + 127) // 128) * 128

    # encode() constants: (x - xmin)/(xmax - xmin) - 0.5 == x*scale - offset,
    # guarded against xmax == xmin (the reference would produce inf/NaN there).
    rng = (xmax - xmin).astype(jnp.float32)
    scale = jnp.where(rng == 0, 0.0, 1.0 / jnp.where(rng == 0, 1.0, rng))
    offset = xmin.astype(jnp.float32) * scale + 0.5
    enc = jnp.concatenate(
        [scale.reshape(1, D_in), offset.reshape(1, D_in)], axis=0)   # (2, D_in)

    # Zero-padded slabs: weights in mxu_dtype (bf16 default), biases in f32.
    w_slab = jnp.zeros((n_layers, P, P), mxu_dtype)
    b_slab = jnp.zeros((n_layers, 1, P), jnp.float32)
    for l, (w, b) in enumerate(params):
        fi, fo = w.shape
        w_slab = w_slab.at[l, :fi, :fo].set(w.astype(mxu_dtype))
        b_slab = b_slab.at[l, 0, :fo].set(b.reshape(-1).astype(jnp.float32))
    return enc, w_slab, b_slab, P


def make_linnet_forward(params, xmin, xmax, *, mxu_dtype=jnp.bfloat16,
                        act_dtype=jnp.float32, max_tile_b=4096,
                        core_parallel=False):
    """Build a jitted forward(x) for fixed params/xmin/xmax."""
    D_in = params[0][0].shape[0]
    D_out = params[-1][0].shape[1]
    n_layers = len(params)
    enc, w_slab, b_slab, P = pack_linnet_params(params, xmin, xmax,
                                                mxu_dtype=mxu_dtype)
    kernel = functools.partial(linnet_kernel, act_dtype=act_dtype)

    # On v7x set core_parallel=True so the batch axis shards across both
    # TensorCores; plain "parallel" is the compile-safe default on v5e/v6e.
    batch_sem = pltpu.CORE_PARALLEL if core_parallel else "parallel"

    @jax.jit
    def forward(x):
        B = x.shape[0]
        tile_b, Bp = _pick_batch_tiling(B, max_tile_b=max_tile_b)
        xp = jnp.pad(x, ((0, Bp - B), (0, 0))) if Bp != B else x

        out = pl.pallas_call(
            kernel,
            out_shape=jax.ShapeDtypeStruct((Bp, D_out), jnp.float32),
            grid_spec=pltpu.PrefetchScalarGridSpec(
                num_scalar_prefetch=0,
                grid=(Bp // tile_b,),
                in_specs=[
                    pl.BlockSpec((tile_b, D_in), lambda i: (i, 0)),       # x, batch-tiled
                    pl.BlockSpec((2, D_in), lambda i: (0, 0)),            # scale/offset
                    pl.BlockSpec((n_layers, P, P), lambda i: (0, 0, 0)),  # packed weights
                    pl.BlockSpec((n_layers, 1, P), lambda i: (0, 0, 0)),  # packed biases
                ],
                # Narrow output: only the real D_out columns hit HBM.
                out_specs=pl.BlockSpec((tile_b, D_out), lambda i: (i, 0)),
            ),
            compiler_params=pltpu.CompilerParams(
                dimension_semantics=(batch_sem,),
                # Explicit budget so large batch tiles fit even on v5e's 16 MiB
                # default scoped limit, while leaving headroom on v7x (64 MiB).
                vmem_limit_bytes=48 * 1024 * 1024),
        )(xp, enc, w_slab, b_slab)

        return out[:B] if Bp != B else out

    return forward


def init_linear(key, fan_in, fan_out):
    """PyTorch-style U(-1/sqrt(fan_in), 1/sqrt(fan_in)); W returned as (in, out)."""
    kw, kb = jax.random.split(key)
    bound = 1.0 / jnp.sqrt(fan_in)
    w = jax.random.uniform(kw, (fan_in, fan_out), jnp.float32, -bound, bound)
    b = jax.random.uniform(kb, (1, fan_out), jnp.float32, -bound, bound)
    return w, b


def linnet_reference(x, xmin, xmax, params):
    h = (x - xmin) / (xmax - xmin) - 0.5
    for w, b in params[:-1]:
        h = jax.nn.sigmoid(h @ w + b)
    w, b = params[-1]
    return h @ w + b


if __name__ == "__main__":
    # Small shapes consistent with the module's forward pass.
    B, D_in, H1, H2, H3, D_out = 16, 16, 32, 32, 16, 8

    key = jax.random.PRNGKey(0)
    keys = jax.random.split(key, 8)

    x = jax.random.normal(keys[0], (B, D_in), jnp.float32)
    xmin = jnp.full((1, D_in), -2.0, jnp.float32)
    xmax = jnp.full((1, D_in), 2.0, jnp.float32)

    dims = [(D_in, H1), (H1, H1), (H1, H2), (H2, H2), (H2, H3), (H3, D_out)]
    params = [init_linear(keys[i + 1], fi, fo) for i, (fi, fo) in enumerate(dims)]

    # 1) Exact path (f32 MXU operands): single grid step, tight tolerance.
    fwd_f32 = make_linnet_forward(params, xmin, xmax, mxu_dtype=jnp.float32)
    y = jax.block_until_ready(fwd_f32(x))
    y_ref = linnet_reference(x, xmin, xmax, params)
    assert y.shape == (B, D_out)
    assert jnp.allclose(y, y_ref, atol=2e-5, rtol=1e-5), \
        float(jnp.max(jnp.abs(y - y_ref)))

    # 2) Fast path (bf16 MXU operands) on a larger batch: exercises the
    #    2-tile "parallel" grid; looser tolerance due to bf16 quantization.
    B2 = 256
    x2 = jax.random.normal(keys[7], (B2, D_in), jnp.float32)
    fwd_bf16 = make_linnet_forward(params, xmin, xmax, mxu_dtype=jnp.bfloat16)
    y2 = jax.block_until_ready(fwd_bf16(x2))
    y2_ref = linnet_reference(x2, xmin, xmax, params)
    assert y2.shape == (B2, D_out)
    assert jnp.allclose(y2, y2_ref, atol=5e-2, rtol=5e-2), \
        float(jnp.max(jnp.abs(y2 - y2_ref)))

    print("KERNEL_OK")
</pallas_src>

<mosaic_0001>
module attributes {stable_mosaic.version = 11 : i64} {
  func.func @linnet_kernel(%arg0: i32, %arg1: memref<16x16xf32, #tpu.memory_space<vmem>>, %arg2: memref<2x16xf32, #tpu.memory_space<vmem>>, %arg3: memref<6x128x128xf32, #tpu.memory_space<vmem>>, %arg4: memref<6x1x128xf32, #tpu.memory_space<vmem>>, %arg5: memref<16x8xf32, #tpu.memory_space<vmem>>) attributes {dimension_semantics = [#tpu.dimension_semantics<parallel>], iteration_bounds = array<i64: 1>, scalar_prefetch = 0 : i64, scratch_operands = 0 : i64, tpu.core_type = #tpu.core_type<tc>, window_params = [{transform_indices = @transform_0, window_bounds = array<i64: 16, 16>}, {pipeline_mode = #tpu.pipeline_mode<synchronous>, transform_indices = @transform_1, window_bounds = array<i64: 2, 16>}, {pipeline_mode = #tpu.pipeline_mode<synchronous>, transform_indices = @transform_2, window_bounds = array<i64: 6, 128, 128>}, {pipeline_mode = #tpu.pipeline_mode<synchronous>, transform_indices = @transform_3, window_bounds = array<i64: 6, 1, 128>}, {transform_indices = @transform_4, window_bounds = array<i64: 16, 8>}]} {
    %c0 = arith.constant 0 : index
    %c0_0 = arith.constant 0 : index
    %0 = vector.load %arg1[%c0, %c0_0] : memref<16x16xf32, #tpu.memory_space<vmem>>, vector<16x16xf32>
    %c0_1 = arith.constant 0 : index
    %c0_2 = arith.constant 0 : index
    %1 = vector.load %arg2[%c0_1, %c0_2] : memref<2x16xf32, #tpu.memory_space<vmem>>, vector<1x16xf32>
    %2 = vector.broadcast %1 : vector<1x16xf32> to vector<16x16xf32>
    %3 = arith.mulf %0, %2 : vector<16x16xf32>
    %c1 = arith.constant 1 : index
    %c0_3 = arith.constant 0 : index
    %4 = vector.load %arg2[%c1, %c0_3] : memref<2x16xf32, #tpu.memory_space<vmem>>, vector<1x16xf32>
    %5 = vector.broadcast %4 : vector<1x16xf32> to vector<16x16xf32>
    %6 = arith.subf %3, %5 : vector<16x16xf32>
    %c0_4 = arith.constant 0 : index
    %c0_5 = arith.constant 0 : index
    %c0_6 = arith.constant 0 : index
    %7 = vector.load %arg3[%c0_4, %c0_5, %c0_6] : memref<6x128x128xf32, #tpu.memory_space<vmem>>, vector<1x16x128xf32>
    %8 = vector.shape_cast %7 : vector<1x16x128xf32> to vector<16x128xf32>
    %cst = arith.constant dense<0.000000e+00> : vector<16x128xf32>
    %9 = tpu.matmul %6, %8, %cst {dimension_numbers = #tpu.dot_dimension_numbers<[1], [0], [0], [1], [0, 0, 1, 1], [], []>} : vector<16x16xf32>, vector<16x128xf32>, vector<16x128xf32> -> vector<16x128xf32>
    %c0_7 = arith.constant 0 : index
    %c0_8 = arith.constant 0 : index
    %c0_9 = arith.constant 0 : index
    %10 = vector.load %arg4[%c0_7, %c0_8, %c0_9] : memref<6x1x128xf32, #tpu.memory_space<vmem>>, vector<1x1x128xf32>
    %11 = vector.shape_cast %10 : vector<1x1x128xf32> to vector<1x128xf32>
    %12 = vector.broadcast %11 : vector<1x128xf32> to vector<16x128xf32>
    %13 = arith.addf %9, %12 : vector<16x128xf32>
    %cst_10 = arith.constant 5.000000e-01 : f32
    %14 = vector.broadcast %cst_10 : f32 to vector<16x128xf32>
    %15 = arith.mulf %14, %13 : vector<16x128xf32>
    %16 = math.tanh %15 : vector<16x128xf32>
    %cst_11 = arith.constant 5.000000e-01 : f32
    %17 = vector.broadcast %cst_11 : f32 to vector<16x128xf32>
    %18 = arith.mulf %17, %16 : vector<16x128xf32>
    %cst_12 = arith.constant 5.000000e-01 : f32
    %19 = vector.broadcast %cst_12 : f32 to vector<16x128xf32>
    %20 = arith.addf %18, %19 : vector<16x128xf32>
    %c1_13 = arith.constant 1 : index
    %c0_14 = arith.constant 0 : index
    %c0_15 = arith.constant 0 : index
    %21 = vector.load %arg3[%c1_13, %c0_14, %c0_15] : memref<6x128x128xf32, #tpu.memory_space<vmem>>, vector<1x128x128xf32>
    %22 = vector.shape_cast %21 : vector<1x128x128xf32> to vector<128x128xf32>
    %cst_16 = arith.constant dense<0.000000e+00> : vector<16x128xf32>
    %23 = tpu.matmul %20, %22, %cst_16 {dimension_numbers = #tpu.dot_dimension_numbers<[1], [0], [0], [1], [0, 0, 1, 1], [], []>} : vector<16x128xf32>, vector<128x128xf32>, vector<16x128xf32> -> vector<16x128xf32>
    %c1_17 = arith.constant 1 : index
    %c0_18 = arith.constant 0 : index
    %c0_19 = arith.constant 0 : index
    %24 = vector.load %arg4[%c1_17, %c0_18, %c0_19] : memref<6x1x128xf32, #tpu.memory_space<vmem>>, vector<1x1x128xf32>
    %25 = vector.shape_cast %24 : vector<1x1x128xf32> to vector<1x128xf32>
    %26 = vector.broadcast %25 : vector<1x128xf32> to vector<16x128xf32>
    %27 = arith.addf %23, %26 : vector<16x128xf32>
    %cst_20 = arith.constant 5.000000e-01 : f32
    %28 = vector.broadcast %cst_20 : f32 to vector<16x128xf32>
    %29 = arith.mulf %28, %27 : vector<16x128xf32>
    %30 = math.tanh %29 : vector<16x128xf32>
    %cst_21 = arith.constant 5.000000e-01 : f32
    %31 = vector.broadcast %cst_21 : f32 to vector<16x128xf32>
    %32 = arith.mulf %31, %30 : vector<16x128xf32>
    %cst_22 = arith.constant 5.000000e-01 : f32
    %33 = vector.broadcast %cst_22 : f32 to vector<16x128xf32>
    %34 = arith.addf %32, %33 : vector<16x128xf32>
    %c2 = arith.constant 2 : index
    %c0_23 = arith.constant 0 : index
    %c0_24 = arith.constant 0 : index
    %35 = vector.load %arg3[%c2, %c0_23, %c0_24] : memref<6x128x128xf32, #tpu.memory_space<vmem>>, vector<1x128x128xf32>
    %36 = vector.shape_cast %35 : vector<1x128x128xf32> to vector<128x128xf32>
    %cst_25 = arith.constant dense<0.000000e+00> : vector<16x128xf32>
    %37 = tpu.matmul %34, %36, %cst_25 {dimension_numbers = #tpu.dot_dimension_numbers<[1], [0], [0], [1], [0, 0, 1, 1], [], []>} : vector<16x128xf32>, vector<128x128xf32>, vector<16x128xf32> -> vector<16x128xf32>
    %c2_26 = arith.constant 2 : index
    %c0_27 = arith.constant 0 : index
    %c0_28 = arith.constant 0 : index
    %38 = vector.load %arg4[%c2_26, %c0_27, %c0_28] : memref<6x1x128xf32, #tpu.memory_space<vmem>>, vector<1x1x128xf32>
    %39 = vector.shape_cast %38 : vector<1x1x128xf32> to vector<1x128xf32>
    %40 = vector.broadcast %39 : vector<1x128xf32> to vector<16x128xf32>
    %41 = arith.addf %37, %40 : vector<16x128xf32>
    %cst_29 = arith.constant 5.000000e-01 : f32
    %42 = vector.broadcast %cst_29 : f32 to vector<16x128xf32>
    %43 = arith.mulf %42, %41 : vector<16x128xf32>
    %44 = math.tanh %43 : vector<16x128xf32>
    %cst_30 = arith.constant 5.000000e-01 : f32
    %45 = vector.broadcast %cst_30 : f32 to vector<16x128xf32>
    %46 = arith.mulf %45, %44 : vector<16x128xf32>
    %cst_31 = arith.constant 5.000000e-01 : f32
    %47 = vector.broadcast %cst_31 : f32 to vector<16x128xf32>
    %48 = arith.addf %46, %47 : vector<16x128xf32>
    %c3 = arith.constant 3 : index
    %c0_32 = arith.constant 0 : index
    %c0_33 = arith.constant 0 : index
    %49 = vector.load %arg3[%c3, %c0_32, %c0_33] : memref<6x128x128xf32, #tpu.memory_space<vmem>>, vector<1x128x128xf32>
    %50 = vector.shape_cast %49 : vector<1x128x128xf32> to vector<128x128xf32>
    %cst_34 = arith.constant dense<0.000000e+00> : vector<16x128xf32>
    %51 = tpu.matmul %48, %50, %cst_34 {dimension_numbers = #tpu.dot_dimension_numbers<[1], [0], [0], [1], [0, 0, 1, 1], [], []>} : vector<16x128xf32>, vector<128x128xf32>, vector<16x128xf32> -> vector<16x128xf32>
    %c3_35 = arith.constant 3 : index
    %c0_36 = arith.constant 0 : index
    %c0_37 = arith.constant 0 : index
    %52 = vector.load %arg4[%c3_35, %c0_36, %c0_37] : memref<6x1x128xf32, #tpu.memory_space<vmem>>, vector<1x1x128xf32>
    %53 = vector.shape_cast %52 : vector<1x1x128xf32> to vector<1x128xf32>
    %54 = vector.broadcast %53 : vector<1x128xf32> to vector<16x128xf32>
    %55 = arith.addf %51, %54 : vector<16x128xf32>
    %cst_38 = arith.constant 5.000000e-01 : f32
    %56 = vector.broadcast %cst_38 : f32 to vector<16x128xf32>
    %57 = arith.mulf %56, %55 : vector<16x128xf32>
    %58 = math.tanh %57 : vector<16x128xf32>
    %cst_39 = arith.constant 5.000000e-01 : f32
    %59 = vector.broadcast %cst_39 : f32 to vector<16x128xf32>
    %60 = arith.mulf %59, %58 : vector<16x128xf32>
    %cst_40 = arith.constant 5.000000e-01 : f32
    %61 = vector.broadcast %cst_40 : f32 to vector<16x128xf32>
    %62 = arith.addf %60, %61 : vector<16x128xf32>
    %c4 = arith.constant 4 : index
    %c0_41 = arith.constant 0 : index
    %c0_42 = arith.constant 0 : index
    %63 = vector.load %arg3[%c4, %c0_41, %c0_42] : memref<6x128x128xf32, #tpu.memory_space<vmem>>, vector<1x128x128xf32>
    %64 = vector.shape_cast %63 : vector<1x128x128xf32> to vector<128x128xf32>
    %cst_43 = arith.constant dense<0.000000e+00> : vector<16x128xf32>
    %65 = tpu.matmul %62, %64, %cst_43 {dimension_numbers = #tpu.dot_dimension_numbers<[1], [0], [0], [1], [0, 0, 1, 1], [], []>} : vector<16x128xf32>, vector<128x128xf32>, vector<16x128xf32> -> vector<16x128xf32>
    %c4_44 = arith.constant 4 : index
    %c0_45 = arith.constant 0 : index
    %c0_46 = arith.constant 0 : index
    %66 = vector.load %arg4[%c4_44, %c0_45, %c0_46] : memref<6x1x128xf32, #tpu.memory_space<vmem>>, vector<1x1x128xf32>
    %67 = vector.shape_cast %66 : vector<1x1x128xf32> to vector<1x128xf32>
    %68 = vector.broadcast %67 : vector<1x128xf32> to vector<16x128xf32>
    %69 = arith.addf %65, %68 : vector<16x128xf32>
    %cst_47 = arith.constant 5.000000e-01 : f32
    %70 = vector.broadcast %cst_47 : f32 to vector<16x128xf32>
    %71 = arith.mulf %70, %69 : vector<16x128xf32>
    %72 = math.tanh %71 : vector<16x128xf32>
    %cst_48 = arith.constant 5.000000e-01 : f32
    %73 = vector.broadcast %cst_48 : f32 to vector<16x128xf32>
    %74 = arith.mulf %73, %72 : vector<16x128xf32>
    %cst_49 = arith.constant 5.000000e-01 : f32
    %75 = vector.broadcast %cst_49 : f32 to vector<16x128xf32>
    %76 = arith.addf %74, %75 : vector<16x128xf32>
    %c5 = arith.constant 5 : index
    %c0_50 = arith.constant 0 : index
    %c0_51 = arith.constant 0 : index
    %77 = vector.load %arg3[%c5, %c0_50, %c0_51] : memref<6x128x128xf32, #tpu.memory_space<vmem>>, vector<1x128x128xf32>
    %78 = vector.shape_cast %77 : vector<1x128x128xf32> to vector<128x128xf32>
    %cst_52 = arith.constant dense<0.000000e+00> : vector<16x128xf32>
    %79 = tpu.matmul %76, %78, %cst_52 {dimension_numbers = #tpu.dot_dimension_numbers<[1], [0], [0], [1], [0, 0, 1, 1], [], []>} : vector<16x128xf32>, vector<128x128xf32>, vector<16x128xf32> -> vector<16x128xf32>
    %c5_53 = arith.constant 5 : index
    %c0_54 = arith.constant 0 : index
    %c0_55 = arith.constant 0 : index
    %80 = vector.load %arg4[%c5_53, %c0_54, %c0_55] : memref<6x1x128xf32, #tpu.memory_space<vmem>>, vector<1x1x128xf32>
    %81 = vector.shape_cast %80 : vector<1x1x128xf32> to vector<1x128xf32>
    %82 = vector.broadcast %81 : vector<1x128xf32> to vector<16x128xf32>
    %83 = arith.addf %79, %82 : vector<16x128xf32>
    %84 = vector.extract_strided_slice %83 {offsets = [0, 0], sizes = [16, 8], strides = [1, 1]} : vector<16x128xf32> to vector<16x8xf32>
    %c0_56 = arith.constant 0 : index
    %c0_57 = arith.constant 0 : index
    %85 = vector.load %arg5[%c0_56, %c0_57] : memref<16x8xf32, #tpu.memory_space<vmem>>, vector<16x8xf32>
    tpu.vector_store %arg5[%c0_56, %c0_57], %84 {strides = array<i32>} : memref<16x8xf32, #tpu.memory_space<vmem>>, vector<16x8xf32>,
    return
  }
  func.func @transform_0(%arg0: i32) -> (i32, i32) {
    %c0_i32 = arith.constant 0 : i32
    %c0_i32_0 = arith.constant 0 : i32
    return %arg0, %c0_i32 : i32, i32
  }
  func.func @transform_1(%arg0: i32) -> (i32, i32) {
    %c0_i32 = arith.constant 0 : i32
    %c0_i32_0 = arith.constant 0 : i32
    %c0_i32_1 = arith.constant 0 : i32
    return %c0_i32, %c0_i32_0 : i32, i32
  }
  func.func @transform_2(%arg0: i32) -> (i32, i32, i32) {
    %c0_i32 = arith.constant 0 : i32
    %c0_i32_0 = arith.constant 0 : i32
    %c0_i32_1 = arith.constant 0 : i32
    %c0_i32_2 = arith.constant 0 : i32
    return %c0_i32, %c0_i32_0, %c0_i32_1 : i32, i32, i32
  }
  func.func @transform_3(%arg0: i32) -> (i32, i32, i32) {
    %c0_i32 = arith.constant 0 : i32
    %c0_i32_0 = arith.constant 0 : i32
    %c0_i32_1 = arith.constant 0 : i32
    %c0_i32_2 = arith.constant 0 : i32
    return %c0_i32, %c0_i32_0, %c0_i32_1 : i32, i32, i32
  }
  func.func @transform_4(%arg0: i32) -> (i32, i32) {
    %c0_i32 = arith.constant 0 : i32
    %c0_i32_0 = arith.constant 0 : i32
    return %arg0, %c0_i32 : i32, i32
  }
}

</mosaic_0001>

<bundles_post_ra>
// kernel: forward.1
= control target key start
LH: loop header
LB: loop body
LE: loop exit
PB: predicated region body
PF: predicated region fallthrough
CT: control target
= control target key end

     0   :  { %9 = vsyncpa [#allocation3], 0  ;;  %s608_s0 = inlined_call_operand.hbm [shape: f32[16,16], index: 0, kind: input, shape index: {}]   ;;  %s609_s1 = inlined_call_operand.hbm [shape: f32[2,16], index: 1, kind: input, shape index: {}]   ;;  %s610_s2 = inlined_call_operand.hbm [shape: f32[6,128,128], index: 2, kind: input, shape index: {}]   ;;  %s611_s3 = inlined_call_operand.hbm [shape: f32[6,1,128], index: 3, kind: input, shape index: {}]   ;;  %s612_s4 = inlined_call_operand.vmem [shape: f32[16,8], index: 4, kind: output, shape index: {}]  }
   0x1   :  { %10 = vsyncpa [#allocation5], 0  ;;  %s30_s17 = sshll.u32 %s609_s1, 4  ;;  %s31_s17 = int_to_ptr.hbm [resolvable:$true] %s30_s17 }
   0x2   :  { %11 = vsyncpa [#allocation8], 0  ;;  %s555_s18 = smov [#allocation4]   ;;  %s16_s22 = sshll.u32 %s608_s0, 4  ;;  %s17_s22 = int_to_ptr.hbm [resolvable:$true] %s16_s22 }
   0x3   :  { %s32_s19 = sshll.u32 %s555_s18, 4  ;;  %s556_s23 = smov [#allocation2]   ;;  %s33_s19 = int_to_ptr.vmem [resolvable:$true] %s32_s19 }
   0x4   :  { %35 = dma.hbm_to_vmem [thread:$0]  %s31_s17, 32, %s33_s19, [#allocation5]  }
   0x5   :  { %s18_s24 = sshll.u32 %s556_s23, 4  ;;  %s557_s25 = smov 128   ;;  %s19_s24 = int_to_ptr.vmem [resolvable:$true] %s18_s24 }
   0x6   :  { %s558_s26 = smov 8   ;;  %s40_s1 = sshll.u32 %s610_s2, 4  ;;  %s41_s1 = int_to_ptr.hbm [resolvable:$true] %s40_s1 }
   0x7   :  { %24 = dma.hbm_to_vmem [thread:$0]  %s17_s22, 256, %s19_s24, [#allocation3], %s557_s25, %s557_s25, %s558_s26  }
   0x8   :  { %s559_s29 = smov [#allocation6]   ;;  %s53_s0 = sshll.u32 %s611_s3, 4  ;;  %s54_s0 = int_to_ptr.hbm [resolvable:$true] %s53_s0 }
   0x9   :  { %s42_s30 = sshll.u32 %s559_s29, 4  ;;  %s560_s7 = smov [#allocation7]   ;;  %s43_s30 = int_to_ptr.vmem [resolvable:$true] %s42_s30 }
   0xa   :  { %48 = dma.hbm_to_vmem [thread:$0]  %s41_s1, 12288, %s43_s30, [#allocation5], %s557_s25, %s557_s25, %s558_s26  }
   0xb   :  { %s55_s8 = sshll.u32 %s560_s7, 4  ;;  %s561_s9 = smov 16   ;;  %s56_s8 = int_to_ptr.vmem [resolvable:$true] %s55_s8 }
   0xc   :  { %s562_s10 = smov 1  }
   0xd   :  { %61 = dma.hbm_to_vmem [thread:$0]  %s54_s0, 96, %s56_s8, [#allocation8], %s561_s9, %s561_s9, %s562_s10  }
   0xe   :  { %549 = dma.done.wait [#allocation3], 256  }
   0xf   :  { %550 = vsyncadd [#allocation3], 4294967040 }
  0x10   :  { %551 = dma.done.wait [#allocation5], 12320  }
  0x11   :  { %552 = vsyncadd [#allocation5], 4294954976 }
  0x12   :  { %553 = dma.done.wait [#allocation8], 96  }
  0x13   :  { %554 = vsyncadd [#allocation8], 4294967200  ;;  %v89_v0 = vld [vmem:[#allocation6 + $0x8] sm:$0xff]  ;;  %v88_v1 = vld [vmem:[#allocation6] sm:$0xff]  ;;  %vm94_vm0 = vcmask 130048   ;;  %vm389_vm1 = vcmask 64512  }
  0x14   :  { %v78_v2 = vld [vmem:[#allocation2] sm:$0xff]  ;;  %115 = vmatpush.msra.mxu0 %v89_v0  ;;  %v425_v3 = vld [vmem:[#allocation4] ss:$0 sm:$0xff]  ;;  %v426_v4 = vld [vmem:[#allocation4 + $0x1] ss:$0 sm:$0xff] }
  0x15   :  { %v148_v5 = vld [vmem:[#allocation6 + $0xf8] sm:$0xff]  ;;  %v82_v6 = vmul.f32 %v425_v3, %v78_v2  ;;  %v147_v7 = vld [vmem:[#allocation6 + $0xf0] sm:$0xff]  ;;  %v146_v9 = vld [vmem:[#allocation6 + $0xe8] sm:$0xff] }
  0x16   :  { %116 = vmatpush.msra.mxu0 %v88_v1  ;;  %154 = vmatpush.msra.mxu1 %v148_v5  ;;  %v79_v8 = vld [vmem:[#allocation2 + $0x8] sm:$0xff]  ;;  %v145_v11 = vld [vmem:[#allocation6 + $0xe0] sm:$0xff]  ;;  %v142_v16 = vld [vmem:[#allocation6 + $0xc8] sm:$0xff] }
  0x17   :  { %v86_v10 = vsub.f32 %v82_v6, %v426_v4  ;;  %v83_v12 = vmul.f32 %v425_v3, %v79_v8  ;;  %v144_v13 = vld [vmem:[#allocation6 + $0xd8] sm:$0xff]  ;;  %v143_v14 = vld [vmem:[#allocation6 + $0xd0] sm:$0xff]  ;;  %v141_v17 = vld [vmem:[#allocation6 + $0xc0] sm:$0xff] }
  0x18   :  { %155 = vmatpush.msra.mxu1 %v147_v7  ;;  %v140_v18 = vld [vmem:[#allocation6 + $0xb8] sm:$0xff]  ;;  %v139_v19 = vld [vmem:[#allocation6 + $0xb0] sm:$0xff]  ;;  %v138_v20 = vld [vmem:[#allocation6 + $0xa8] sm:$0xff] }
  0x19   :  { %399 = vmatmul.msk.f32.vlgmr.msra.gmra.mxu0 %vm94_vm0, %v86_v10  ;;  %v87_v15 = vsub.f32 %v83_v12, %v426_v4  ;;  %v137_v21 = vld [vmem:[#allocation6 + $0xa0] sm:$0xff]  ;;  %v136_v22 = vld [vmem:[#allocation6 + $0x98] sm:$0xff]  ;;  %v135_v23 = vld [vmem:[#allocation6 + $0x90] sm:$0xff] }
  0x1a   :  { %156 = vmatpush.msra.mxu1 %v146_v9  ;;  %v134_v24 = vld [vmem:[#allocation6 + $0x88] sm:$0xff]  ;;  %v133_v25 = vld [vmem:[#allocation6 + $0x80] sm:$0xff]  ;;  %v201_v26 = vld [vmem:[#allocation6 + $0x178] sm:$0xff] }
  0x1b   :  { %v200_v27 = vld [vmem:[#allocation6 + $0x170] sm:$0xff]  ;;  %207 = vmatpush.msra.mxu2 %v201_v26  ;;  %v199_v28 = vld [vmem:[#allocation6 + $0x168] sm:$0xff]  ;;  %v198_v29 = vld [vmem:[#allocation6 + $0x160] sm:$0xff] }
  0x1c   :  { %157 = vmatpush.msra.mxu1 %v145_v11  ;;  %v427_v30 = vld [vmem:[#allocation7] ss:$0 sm:$0xff]  ;;  %v197_v31 = vld [vmem:[#allocation6 + $0x158] sm:$0xff]  ;;  %v196_v33 = vld [vmem:[#allocation6 + $0x150] sm:$0xff] }
  0x1d   :  { %208 = vmatpush.msra.mxu2 %v200_v27  ;;  %v195_v35 = vld [vmem:[#allocation6 + $0x148] sm:$0xff]  ;;  %v194_v37 = vld [vmem:[#allocation6 + $0x140] sm:$0xff]  ;;  %v193_v47 = vld [vmem:[#allocation6 + $0x138] sm:$0xff] }
  0x1e   :  { %158 = vmatpush.msra.mxu1 %v144_v13  ;;  %v192_v48 = vld [vmem:[#allocation6 + $0x130] sm:$0xff]  ;;  %v191_v49 = vld [vmem:[#allocation6 + $0x128] sm:$0xff]  ;;  %v190_v50 = vld [vmem:[#allocation6 + $0x120] sm:$0xff] }
  0x1f   :  { %209 = vmatpush.msra.mxu2 %v199_v28  ;;  %v189_v51 = vld [vmem:[#allocation6 + $0x118] sm:$0xff]  ;;  %v188_v52 = vld [vmem:[#allocation6 + $0x110] sm:$0xff]  ;;  %v187_v53 = vld [vmem:[#allocation6 + $0x108] sm:$0xff] }
  0x20   :  { %159 = vmatpush.msra.mxu1 %v143_v14  ;;  %v186_v54 = vld [vmem:[#allocation6 + $0x100] sm:$0xff]  ;;  %v254_v55 = vld [vmem:[#allocation6 + $0x1f8] sm:$0xff]  ;;  %v253_v56 = vld [vmem:[#allocation6 + $0x1f0] sm:$0xff] }
  0x21   :  { %400 = vmatmul.msk.f32.gmra.mxu0 %vm94_vm0, %v87_v15  ;;  %210 = vmatpush.msra.mxu2 %v198_v29  ;;  %v252_v57 = vld [vmem:[#allocation6 + $0x1e8] sm:$0xff]  ;;  %v251_v58 = vld [vmem:[#allocation6 + $0x1e0] sm:$0xff]  ;;  %v250_v60 = vld [vmem:[#allocation6 + $0x1d8] sm:$0xff] }
  0x22   :  { %160 = vmatpush.msra.mxu1 %v142_v16  ;;  %260 = vmatpush.msra.mxu3 %v254_v55  ;;  %v428_v59 = vld [vmem:[#allocation7 + $0x1] ss:$0 sm:$0xff]  ;;  %v249_v62 = vld [vmem:[#allocation6 + $0x1d0] sm:$0xff]  ;;  %v248_v0 = vld [vmem:[#allocation6 + $0x1c8] sm:$0xff] }
  0x23   :  { %211 = vmatpush.msra.mxu2 %v197_v31  ;;  %v247_v2 = vld [vmem:[#allocation6 + $0x1c0] sm:$0xff]  ;;  %v246_v12 = vld [vmem:[#allocation6 + $0x1b8] sm:$0xff]  ;;  %v245_v13 = vld [vmem:[#allocation6 + $0x1b0] sm:$0xff] }
  0x24   :  { %161 = vmatpush.msra.mxu1 %v141_v17  ;;  %261 = vmatpush.msra.mxu3 %v253_v56  ;;  %v244_v14 = vld [vmem:[#allocation6 + $0x1a8] sm:$0xff]  ;;  %v243_v15 = vld [vmem:[#allocation6 + $0x1a0] sm:$0xff]  ;;  %v242_v16 = vld [vmem:[#allocation6 + $0x198] sm:$0xff] }
  0x25   :  { %212 = vmatpush.msra.mxu2 %v196_v33  ;;  %v241_v17 = vld [vmem:[#allocation6 + $0x190] sm:$0xff]  ;;  %v301_v29 = vld [vmem:[#allocation6 + $0x248] sm:$0xff]  ;;  %v300_v31 = vld [vmem:[#allocation6 + $0x240] sm:$0xff] }
  0x26   :  { %162 = vmatpush.msra.mxu1 %v140_v18  ;;  %262 = vmatpush.msra.mxu3 %v252_v57  ;;  %v240_v18 = vld [vmem:[#allocation6 + $0x188] sm:$0xff]  ;;  %v302_v27 = vld [vmem:[#allocation6 + $0x250] sm:$0xff] }
  0x27   :  { %213 = vmatpush.msra.mxu2 %v195_v35  ;;  %v355_v56 = vld [vmem:[#allocation6 + $0x2d0] sm:$0xff] }
  0x28   :  { %163 = vmatpush.msra.mxu1 %v139_v19  ;;  %263 = vmatpush.msra.mxu3 %v251_v58  ;;  %v239_v19 = vld [vmem:[#allocation6 + $0x180] sm:$0xff]  ;;  %v354_v58 = vld [vmem:[#allocation6 + $0x2c8] sm:$0xff] }
  0x29   :  { %214 = vmatpush.msra.mxu2 %v194_v37 }
  0x2a   :  { %164 = vmatpush.msra.mxu1 %v138_v20  ;;  %264 = vmatpush.msra.mxu3 %v250_v60  ;;  %v307_v20 = vld [vmem:[#allocation6 + $0x278] sm:$0xff]  ;;  %v353_v60 = vld [vmem:[#allocation6 + $0x2c0] sm:$0xff] }
  0x2b   :  { %215 = vmatpush.msra.mxu2 %v193_v47  ;;  %313 = vmatpush.msrb.mxu0 %v307_v20  ;;  %v293_v47 = vld [vmem:[#allocation6 + $0x208] sm:$0xff] }
  0x2c   :  { %165 = vmatpush.msra.mxu1 %v137_v21  ;;  %265 = vmatpush.msra.mxu3 %v249_v62  ;;  %v306_v21 = vld [vmem:[#allocation6 + $0x270] sm:$0xff] }
  0x2d   :  { %216 = vmatpush.msra.mxu2 %v192_v48  ;;  %314 = vmatpush.msrb.mxu0 %v306_v21  ;;  %v292_v48 = vld [vmem:[#allocation6 + $0x200] sm:$0xff] }
  0x2e   :  { %166 = vmatpush.msra.mxu1 %v136_v22  ;;  %266 = vmatpush.msra.mxu3 %v248_v0  ;;  %v305_v22 = vld [vmem:[#allocation6 + $0x268] sm:$0xff] }
  0x2f   :  { %217 = vmatpush.msra.mxu2 %v191_v49  ;;  %315 = vmatpush.msrb.mxu0 %v305_v22  ;;  %v360_v49 = vld [vmem:[#allocation6 + $0x2f8] sm:$0xff] }
  0x30   :  { %167 = vmatpush.msra.mxu1 %v135_v23  ;;  %267 = vmatpush.msra.mxu3 %v247_v2  ;;  %v304_v23 = vld [vmem:[#allocation6 + $0x260] sm:$0xff] }
  0x31   :  { %218 = vmatpush.msra.mxu2 %v190_v50  ;;  %316 = vmatpush.msrb.mxu0 %v304_v23  ;;  %v359_v50 = vld [vmem:[#allocation6 + $0x2f0] sm:$0xff] }
  0x32   :  { %168 = vmatpush.msra.mxu1 %v134_v24  ;;  %268 = vmatpush.msra.mxu3 %v246_v12  ;;  %v429_v24 = vld [vmem:[#allocation7 + $0x2] ss:$0 sm:$0xff]  ;;  %v346_v12 = vld [vmem:[#allocation6 + $0x288] sm:$0xff] }
  0x33   :  { %219 = vmatpush.msra.mxu2 %v189_v51  ;;  %v358_v51 = vld [vmem:[#allocation6 + $0x2e8] sm:$0xff] }
  0x34   :  { %169 = vmatpush.msra.mxu1 %v133_v25  ;;  %269 = vmatpush.msra.mxu3 %v245_v13  ;;  %v303_v25 = vld [vmem:[#allocation6 + $0x258] sm:$0xff]  ;;  %v345_v13 = vld [vmem:[#allocation6 + $0x280] sm:$0xff] }
  0x35   :  { %220 = vmatpush.msra.mxu2 %v188_v52  ;;  %317 = vmatpush.msrb.mxu0 %v303_v25  ;;  %v357_v52 = vld [vmem:[#allocation6 + $0x2e0] sm:$0xff] }
  0x36   :  { %270 = vmatpush.msra.mxu3 %v244_v14  ;;  %366 = vmatpush.msrb.mxu1 %v360_v49  ;;  %v431_v14 = vld [vmem:[#allocation7 + $0x4] ss:$0 sm:$0xff] }
  0x37   :  { %221 = vmatpush.msra.mxu2 %v187_v53  ;;  %318 = vmatpush.msrb.mxu0 %v302_v27  ;;  %v430_v53 = vld [vmem:[#allocation7 + $0x3] ss:$0 sm:$0xff]  ;;  %v432_v27 = vld [vmem:[#allocation7 + $0x5] ss:$0 sm:$0xff] }
  0x38   :  { %271 = vmatpush.msra.mxu3 %v243_v15  ;;  %367 = vmatpush.msrb.mxu1 %v359_v50 }
  0x39   :  { %222 = vmatpush.msra.mxu2 %v186_v54  ;;  %319 = vmatpush.msrb.mxu0 %v301_v29  ;;  %v356_v54 = vld [vmem:[#allocation6 + $0x2d8] sm:$0xff] }
  0x3a   :  { %272 = vmatpush.msra.mxu3 %v242_v16  ;;  %368 = vmatpush.msrb.mxu1 %v358_v51 }
  0x3b   :  { %320 = vmatpush.msrb.mxu0 %v300_v31  ;;  %401 = vmatpush.msrb.mxu2 %v360_v49 }
  0x3c   :  { %273 = vmatpush.msra.mxu3 %v241_v17  ;;  %369 = vmatpush.msrb.mxu1 %v357_v52 }
  0x3d   :  { %402 = vmatpush.msrb.mxu2 %v359_v50 }
  0x3e   :  { %274 = vmatpush.msra.mxu3 %v240_v18  ;;  %370 = vmatpush.msrb.mxu1 %v356_v54 }
  0x3f   :  { %403 = vmatpush.msrb.mxu2 %v358_v51 }
  0x40   :  { %275 = vmatpush.msra.mxu3 %v239_v19  ;;  %371 = vmatpush.msrb.mxu1 %v355_v56 }
  0x41   :  { %404 = vmatpush.msrb.mxu2 %v357_v52 }
  0x42   :  { %372 = vmatpush.msrb.mxu1 %v354_v58 }
  0x43   :  { %405 = vmatpush.msrb.mxu2 %v356_v54 }
  0x44   :  { %373 = vmatpush.msrb.mxu1 %v353_v60 }
  0x45   :  { %406 = vmatpush.msrb.mxu2 %v355_v56 }
  0x47   :  { %407 = vmatpush.msrb.mxu2 %v354_v58 }
  0x49   :  { %408 = vmatpush.msrb.mxu2 %v353_v60 }
  0x96   :  { %v118_v32 = vpop.f32.mrf.mxu0 }
  0x97   :  { %v119_v34 = vadd.f32 %v427_v30, %v118_v32 }
  0x99   :  { %v124_v36 = vmul.f32 0.5, %v119_v34 }
  0x9b   :  { %433 = vtanh.f32 %v124_v36 }
  0x9e   :  { %v121_v38 = vpop.f32.mrf.mxu0 }
  0x9f   :  { %v122_v39 = vadd.f32 %v427_v30, %v121_v38 }
  0xa1   :  { %v434_v40 = vpop.eup %433  ;;  %v125_v41 = vmul.f32 0.5, %v122_v39 }
  0xa2   :  { %v128_v42 = vmul.f32 0.5, %v434_v40 }
  0xa3   :  { %435 = vtanh.f32 %v125_v41  ;;  %v299_v41 = vld [vmem:[#allocation6 + $0x238] sm:$0xff] }
  0xa4   :  { %v130_v43 = vadd.f32 0.5, %v128_v42  ;;  %321 = vmatpush.msrb.mxu0 %v299_v41  ;;  %v298_v42 = vld [vmem:[#allocation6 + $0x230] sm:$0xff] }
  0xa6   :  { %170 = vmatmul.f32.vlgmr.msra.gmra.mxu1 %v130_v43  ;;  %322 = vmatpush.msrb.mxu0 %v298_v42  ;;  %v297_v43 = vld [vmem:[#allocation6 + $0x228] sm:$0xff] }
  0xa8   :  { %323 = vmatpush.msrb.mxu0 %v297_v43 }
  0xa9   :  { %v436_v44 = vpop.eup %435 }
  0xaa   :  { %v129_v45 = vmul.f32 0.5, %v436_v44  ;;  %v296_v44 = vld [vmem:[#allocation6 + $0x220] sm:$0xff] }
  0xab   :  { %324 = vmatpush.msrb.mxu0 %v296_v44 }
  0xac   :  { %v131_v46 = vadd.f32 0.5, %v129_v45  ;;  %v295_v45 = vld [vmem:[#allocation6 + $0x218] sm:$0xff] }
  0xad   :  { %325 = vmatpush.msrb.mxu0 %v295_v45 }
  0xae   :  { %173 = vmatmul.f32.gmra.mxu1 %v131_v46  ;;  %v294_v46 = vld [vmem:[#allocation6 + $0x210] sm:$0xff] }
  0xaf   :  { %326 = vmatpush.msrb.mxu0 %v294_v46 }
  0xb1   :  { %327 = vmatpush.msrb.mxu0 %v293_v47 }
  0xb3   :  { %328 = vmatpush.msrb.mxu0 %v292_v48 }
 0x123   :  { %v171_v61 = vpop.f32.mrf.mxu1 }
 0x124   :  { %v172_v63 = vadd.f32 %v428_v59, %v171_v61 }
 0x126   :  { %v177_v1 = vmul.f32 0.5, %v172_v63 }
 0x128   :  { %437 = vtanh.f32 %v177_v1 }
 0x12b   :  { %v174_v3 = vpop.f32.mrf.mxu1 }
 0x12c   :  { %v175_v4 = vadd.f32 %v428_v59, %v174_v3 }
 0x12e   :  { %v438_v5 = vpop.eup %437  ;;  %v178_v6 = vmul.f32 0.5, %v175_v4 }
 0x12f   :  { %v181_v7 = vmul.f32 0.5, %v438_v5 }
 0x130   :  { %439 = vtanh.f32 %v178_v6  ;;  %v352_v6 = vld [vmem:[#allocation6 + $0x2b8] sm:$0xff] }
 0x131   :  { %v183_v8 = vadd.f32 0.5, %v181_v7  ;;  %374 = vmatpush.msrb.mxu1 %v352_v6  ;;  %409 = vmatpush.msrb.mxu2 %v352_v6  ;;  %v351_v7 = vld [vmem:[#allocation6 + $0x2b0] sm:$0xff] }
 0x133   :  { %223 = vmatmul.f32.vlgmr.msra.gmra.mxu2 %v183_v8  ;;  %375 = vmatpush.msrb.mxu1 %v351_v7  ;;  %v350_v8 = vld [vmem:[#allocation6 + $0x2a8] sm:$0xff] }
 0x134   :  { %410 = vmatpush.msrb.mxu2 %v351_v7 }
 0x135   :  { %376 = vmatpush.msrb.mxu1 %v350_v8 }
 0x136   :  { %v440_v9 = vpop.eup %439  ;;  %411 = vmatpush.msrb.mxu2 %v350_v8 }
 0x137   :  { %v182_v10 = vmul.f32 0.5, %v440_v9  ;;  %v349_v9 = vld [vmem:[#allocation6 + $0x2a0] sm:$0xff] }
 0x138   :  { %377 = vmatpush.msrb.mxu1 %v349_v9  ;;  %412 = vmatpush.msrb.mxu2 %v349_v9 }
 0x139   :  { %v184_v11 = vadd.f32 0.5, %v182_v10  ;;  %v348_v10 = vld [vmem:[#allocation6 + $0x298] sm:$0xff] }
 0x13a   :  { %378 = vmatpush.msrb.mxu1 %v348_v10  ;;  %413 = vmatpush.msrb.mxu2 %v348_v10 }
 0x13b   :  { %226 = vmatmul.f32.gmra.mxu2 %v184_v11  ;;  %v347_v11 = vld [vmem:[#allocation6 + $0x290] sm:$0xff] }
 0x13c   :  { %379 = vmatpush.msrb.mxu1 %v347_v11  ;;  %414 = vmatpush.msrb.mxu2 %v347_v11 }
 0x13e   :  { %380 = vmatpush.msrb.mxu1 %v346_v12  ;;  %415 = vmatpush.msrb.mxu2 %v346_v12 }
 0x140   :  { %381 = vmatpush.msrb.mxu1 %v345_v13  ;;  %416 = vmatpush.msrb.mxu2 %v345_v13 }
 0x1b6   :  { %v224_v26 = vpop.f32.mrf.mxu2 }
 0x1b7   :  { %v225_v28 = vadd.f32 %v429_v24, %v224_v26 }
 0x1b9   :  { %v230_v30 = vmul.f32 0.5, %v225_v28 }
 0x1bb   :  { %441 = vtanh.f32 %v230_v30 }
 0x1be   :  { %v227_v32 = vpop.f32.mrf.mxu2 }
 0x1bf   :  { %v228_v33 = vadd.f32 %v429_v24, %v227_v32 }
 0x1c1   :  { %v442_v34 = vpop.eup %441  ;;  %v231_v35 = vmul.f32 0.5, %v228_v33 }
 0x1c2   :  { %v234_v36 = vmul.f32 0.5, %v442_v34 }
 0x1c3   :  { %443 = vtanh.f32 %v231_v35 }
 0x1c4   :  { %v236_v37 = vadd.f32 0.5, %v234_v36 }
 0x1c6   :  { %276 = vmatmul.f32.vlgmr.msra.gmra.mxu3 %v236_v37 }
 0x1c9   :  { %v444_v38 = vpop.eup %443 }
 0x1ca   :  { %v235_v39 = vmul.f32 0.5, %v444_v38 }
 0x1cc   :  { %v237_v40 = vadd.f32 0.5, %v235_v39 }
 0x1ce   :  { %279 = vmatmul.f32.gmra.mxu3 %v237_v40 }
 0x249   :  { %v277_v55 = vpop.f32.mrf.mxu3 }
 0x24a   :  { %v278_v57 = vadd.f32 %v430_v53, %v277_v55 }
 0x24c   :  { %v283_v59 = vmul.f32 0.5, %v278_v57 }
 0x24e   :  { %445 = vtanh.f32 %v283_v59 }
 0x251   :  { %v280_v61 = vpop.f32.mrf.mxu3 }
 0x252   :  { %v281_v62 = vadd.f32 %v430_v53, %v280_v61 }
 0x254   :  { %v446_v63 = vpop.eup %445  ;;  %v284_v0 = vmul.f32 0.5, %v281_v62 }
 0x255   :  { %v287_v1 = vmul.f32 0.5, %v446_v63 }
 0x256   :  { %447 = vtanh.f32 %v284_v0 }
 0x257   :  { %v289_v2 = vadd.f32 0.5, %v287_v1 }
 0x259   :  { %329 = vmatmul.f32.vlgmr.msrb.gmra.mxu0 %v289_v2 }
 0x25c   :  { %v448_v3 = vpop.eup %447 }
 0x25d   :  { %v288_v4 = vmul.f32 0.5, %v448_v3 }
 0x25f   :  { %v290_v5 = vadd.f32 0.5, %v288_v4 }
 0x261   :  { %332 = vmatmul.f32.gmra.mxu0 %v290_v5 }
 0x2d6   :  { %v330_v15 = vpop.f32.mrf.mxu0 }
 0x2d7   :  { %v331_v16 = vadd.f32 %v431_v14, %v330_v15 }
 0x2d9   :  { %v336_v17 = vmul.f32 0.5, %v331_v16 }
 0x2db   :  { %449 = vtanh.f32 %v336_v17 }
 0x2de   :  { %v333_v18 = vpop.f32.mrf.mxu0 }
 0x2df   :  { %v334_v19 = vadd.f32 %v431_v14, %v333_v18 }
 0x2e1   :  { %v450_v20 = vpop.eup %449  ;;  %v337_v21 = vmul.f32 0.5, %v334_v19 }
 0x2e2   :  { %v340_v22 = vmul.f32 0.5, %v450_v20 }
 0x2e3   :  { %451 = vtanh.f32 %v337_v21 }
 0x2e4   :  { %v342_v23 = vadd.f32 0.5, %v340_v22 }
 0x2e6   :  { %382 = vmatmul.f32.vlgmr.msrb.gmra.mxu1 %v342_v23 }
 0x2e9   :  { %v452_v24 = vpop.eup %451 }
 0x2ea   :  { %v341_v25 = vmul.f32 0.5, %v452_v24 }
 0x2ec   :  { %v343_v26 = vadd.f32 0.5, %v341_v25 }
 0x2ee   :  { %385 = vmatmul.f32.vlgmr.msrb.gmra.mxu2 %v343_v26 }
 0x363   :  { %v383_v28 = vpop.f32.mrf.mxu1 }
 0x364   :  { %v384_v29 = vadd.f32 %v432_v27, %v383_v28 }
 0x366   :  { %390 = vst.msk [vmem:[%s612_s4] sm:$0xff] %vm389_vm1, %v384_v29 }
 0x371   :  { %v386_v30 = vpop.f32.mrf.mxu2 }
 0x372   :  { %v387_v31 = vadd.f32 %v432_v27, %v386_v30 }
 0x374   :  { %391 = vst.msk [vmem:[%s612_s4 + $0x8] sm:$0xff] %vm389_vm1, %v387_v31 }
 0x375   :  { %396 = vsyncpa [#allocation3], 1 }
 0x376   :  { %397 = vsyncpa [#allocation5], 1 }
 0x377   :  { %398 = vsyncpa [#allocation8], 1 }

</bundles_post_ra>
